<compile_context>
chip_gen: v6e
topology: v6e:2x2x1
jax: 0.10.0
libtpu: 0.0.40
codegen_flags: <defaults>
</compile_context>

<pallas_src>
import numpy as np
import jax
import jax.numpy as jnp
from jax.experimental import pallas as pl
from jax.experimental.pallas import tpu as pltpu


def _round_up(a, m):
    return (a + m - 1) // m * m


def _build_kernel(offs, KKC, Cin, KH, H, R, OUTW, XOFF):
    """Kernel factory for fixed static dims / slab offsets."""
    (oW1, ob1, oW2, ob2, oWd, obd, oWl1, obl1, oWl2, obl2) = offs

    def kernel(xact_ref, w_ref, out_ref):
        # activation slab: [ conv im2col | pad | x_last | pad ]
        xbig = xact_ref[:, 0:KKC]                       # (TB, k*k*Cin)
        xlast = xact_ref[:, XOFF:XOFF + Cin]            # (TB, Cin)

        # conv1 at the k tap positions conv2 consumes: one block-diagonal dot
        W1 = w_ref[oW1:oW1 + KKC, 0:KH]
        b1 = w_ref[ob1:ob1 + 1, 0:KH]
        h1 = jnp.maximum(
            jnp.dot(xbig, W1, preferred_element_type=jnp.float32) + b1, 0.0)

        # conv2 at t = T-1 (weight blocks for pre-t=0 taps were zeroed wrapper-side)
        W2 = w_ref[oW2:oW2 + KH, 0:H]
        b2 = w_ref[ob2:ob2 + 1, 0:H]
        h2 = jnp.maximum(
            jnp.dot(h1, W2, preferred_element_type=jnp.float32) + b2, 0.0)

        # residual branch: 1x1 downsample conv at t = T-1
        Wd = w_ref[oWd:oWd + Cin, 0:H]
        bd = w_ref[obd:obd + 1, 0:H]
        res = jnp.dot(xlast, Wd, preferred_element_type=jnp.float32) + bd

        last = h2 + res                                  # (TB, H)

        # head: l1 -> LeakyReLU(0.01) -> l2
        Wl1 = w_ref[oWl1:oWl1 + H, 0:R]
        bl1 = w_ref[obl1:obl1 + 1, 0:R]
        z1 = jnp.dot(last, Wl1, preferred_element_type=jnp.float32) + bl1
        a1 = jnp.where(z1 > 0, z1, 0.01 * z1)

        Wl2 = w_ref[oWl2:oWl2 + R, 0:OUTW]
        bl2 = w_ref[obl2:obl2 + 1, 0:OUTW]
        rep = jnp.dot(a1, Wl2, preferred_element_type=jnp.float32) + bl2
        out_ref[...] = rep.astype(out_ref.dtype)         # lane-dense (TB, 128k)

    return kernel


def net_forward(x, params, k, d):
    """x: (B, T, input_dim) float32 -> rep: (B, emb_dim) float32."""
    B, T, Cin = x.shape
    H = params["w1"].shape[2]
    R = params["wl1"].shape[1]
    E = params["wl2"].shape[1]
    KH = k * H
    KKC = k * k * Cin

    # ---- activation slab (wrapper-side im2col, layout plumbing only) --------
    # x times the last output step depends on: T-1 - m*d for m = 0..2k-2.
    times = np.array([T - 1 - (2 * k - 2 - m) * d for m in range(2 * k - 1)])
    valid = (times >= 0).astype(np.float32)
    xs = x[:, np.maximum(times, 0), :] * jnp.asarray(valid)[None, :, None]

    # conv1 im2col at the k tap positions conv2 consumes (row q uses xs[q:q+k])
    tap_idx = np.array([q + i for q in range(k) for i in range(k)])
    xbig = xs[:, tap_idx, :].reshape(B, KKC)
    x_last = x[:, T - 1, :]

    XOFF = _round_up(KKC, 128)
    XW = _round_up(XOFF + Cin, 128)
    xact = jnp.zeros((B, XW), jnp.float32)
    xact = xact.at[:, :KKC].set(xbig).at[:, XOFF:XOFF + Cin].set(x_last)

    Bp = _round_up(B, 8)
    TB = Bp if Bp <= 128 else 128
    Bp = _round_up(Bp, TB)
    xact = jnp.pad(xact, ((0, Bp - B), (0, 0)))

    # ---- weight slab ---------------------------------------------------------
    w1f = params["w1"].reshape(k * Cin, H)                       # (k*Cin, H)
    W1big = jax.scipy.linalg.block_diag(*([w1f] * k))            # (k*k*Cin, k*H)
    b1big = jnp.tile(params["b1"], (1, k))                       # (1, k*H)

    # zero conv2 weight blocks whose h1 tap time is before t=0 (causal padding)
    tap_t = np.array([T - 1 - (k - 1 - q) * d for q in range(k)])
    w2mask = jnp.asarray((tap_t >= 0).astype(np.float32))
    W2f = (params["w2"] * w2mask[:, None, None]).reshape(KH, H)  # (k*H, H)

    OUTW = _round_up(E, 128)
    Wl2p = jnp.zeros((R, OUTW), jnp.float32).at[:, :E].set(params["wl2"])
    bl2p = jnp.zeros((1, OUTW), jnp.float32).at[:, :E].set(params["bl2"])

    sections = [W1big, b1big, W2f, params["b2"], params["wd"], params["bd"],
                params["wl1"], params["bl1"], Wl2p, bl2p]
    SW = _round_up(max(max(s.shape[1] for s in sections), 128), 128)
    offs = []
    rows = 0
    for s in sections:
        offs.append(rows)
        rows += _round_up(s.shape[0], 8)
    slab = jnp.zeros((rows, SW), jnp.float32)
    for o, s in zip(offs, sections):
        slab = slab.at[o:o + s.shape[0], :s.shape[1]].set(s)

    kernel = _build_kernel(tuple(offs), KKC, Cin, KH, H, R, OUTW, XOFF)

    out = pl.pallas_call(
        kernel,
        out_shape=jax.ShapeDtypeStruct((Bp, OUTW), jnp.float32),
        grid=(Bp // TB,),
        in_specs=[pl.BlockSpec((TB, XW), lambda i: (i, 0)),
                  pl.BlockSpec((rows, SW), lambda i: (0, 0))],   # weights resident
        out_specs=pl.BlockSpec((TB, OUTW), lambda i: (i, 0)),
        compiler_params=pltpu.CompilerParams(
            dimension_semantics=("parallel",)),
    )(xact, slab)

    return out[:B, :E]


def init_params(key, input_dim, hidden, rep_hidden, emb_dim, k):
    """Deterministic synthetic parameters (weight_norm materialized)."""
    ks = jax.random.split(key, 12)

    def weight_norm(v, g):
        # torch weight_norm over a Conv1d weight (O, I, k): per-output-channel norm
        n = jnp.sqrt(jnp.sum(v * v, axis=(1, 2), keepdims=True))
        return g[:, None, None] * v / n

    # conv1 / conv2 (torch layout (O, I, k)), then transpose to kernel layout (k, I, O)
    v1 = 0.01 * jax.random.normal(ks[0], (hidden, input_dim, k), jnp.float32)
    g1 = 1.0 + 0.1 * jax.random.normal(ks[1], (hidden,), jnp.float32)
    w1 = jnp.transpose(weight_norm(v1, g1), (2, 1, 0))
    v2 = 0.01 * jax.random.normal(ks[2], (hidden, hidden, k), jnp.float32)
    g2 = 1.0 + 0.1 * jax.random.normal(ks[3], (hidden,), jnp.float32)
    w2 = jnp.transpose(weight_norm(v2, g2), (2, 1, 0))
    b1 = 0.01 * jax.random.normal(ks[4], (1, hidden), jnp.float32)
    b2 = 0.01 * jax.random.normal(ks[5], (1, hidden), jnp.float32)

    # downsample 1x1 conv (input_dim != hidden)
    wd = 0.01 * jax.random.normal(ks[6], (input_dim, hidden), jnp.float32)
    bd = 0.01 * jax.random.normal(ks[7], (1, hidden), jnp.float32)

    # linear heads, stored transposed (in, out)
    wl1 = 0.1 * jax.random.normal(ks[8], (hidden, rep_hidden), jnp.float32)
    bl1 = 0.01 * jax.random.normal(ks[9], (1, rep_hidden), jnp.float32)
    wl2 = 0.1 * jax.random.normal(ks[10], (rep_hidden, emb_dim), jnp.float32)
    bl2 = 0.01 * jax.random.normal(ks[11], (1, emb_dim), jnp.float32)

    return dict(w1=w1, b1=b1, w2=w2, b2=b2, wd=wd, bd=bd,
                wl1=wl1, bl1=bl1, wl2=wl2, bl2=bl2)


def ref_forward(x, params, k, d):
    """Pure-JAX reference (lax conv), mirrors the PyTorch forward."""
    p = (k - 1) * d
    T = x.shape[1]
    xc = jnp.transpose(x, (0, 2, 1))  # NCL, like torch after x.transpose(2,1)

    def causal(inp, w_kio, bias):
        w_oik = jnp.transpose(w_kio, (2, 1, 0))
        y = jax.lax.conv_general_dilated(
            inp, w_oik, window_strides=(1,), padding=[(p, p)],
            rhs_dilation=(d,), dimension_numbers=("NCH", "OIH", "NCH"))
        return y[:, :, :T] + bias.reshape(1, -1, 1)  # Chomp1d(p)

    h1 = jax.nn.relu(causal(xc, params["w1"], params["b1"]))
    h2 = jax.nn.relu(causal(h1, params["w2"], params["b2"]))
    wd_oik = params["wd"].T[:, :, None]
    res = jax.lax.conv_general_dilated(
        xc, wd_oik, window_strides=(1,), padding=[(0, 0)],
        dimension_numbers=("NCH", "OIH", "NCH")) + params["bd"].reshape(1, -1, 1)
    out = jnp.transpose(h2 + res, (0, 2, 1))  # (B, T, H)
    last = out[:, -1]
    z1 = last @ params["wl1"] + params["bl1"]
    a1 = jnp.where(z1 > 0, z1, 0.01 * z1)
    return a1 @ params["wl2"] + params["bl2"]


if __name__ == "__main__":
    # small shapes consistent with NetModule defaults:
    # hidden_dims=32 (single TCN layer, dilation 2**0=1), kernel_size=3,
    # rep_hidden=32, emb_dim=10, dup=False, pretext=False -> returns rep only.
    B, T, input_dim = 2, 16, 8
    hidden, rep_hidden, emb_dim, k, d = 32, 32, 10, 3, 1

    key = jax.random.PRNGKey(0)
    kx, kx2, kp = jax.random.split(key, 3)
    x = jax.random.normal(kx, (B, T, input_dim), jnp.float32)
    params = init_params(kp, input_dim, hidden, rep_hidden, emb_dim, k)

    rep = jax.block_until_ready(net_forward(x, params, k, d))
    assert rep.shape == (B, emb_dim)
    ref = ref_forward(x, params, k, d)
    np.testing.assert_allclose(np.asarray(rep), np.asarray(ref),
                               rtol=1e-4, atol=1e-5)

    # extra check: short sequence (T <= causal padding) with dilation 2, so the
    # zero-padding (Chomp) paths of both convs are actually exercised.
    T2, d2 = 3, 2
    x2 = jax.random.normal(kx2, (B, T2, input_dim), jnp.float32)
    rep2 = jax.block_until_ready(net_forward(x2, params, k, d2))
    ref2 = ref_forward(x2, params, k, d2)
    np.testing.assert_allclose(np.asarray(rep2), np.asarray(ref2),
                               rtol=1e-4, atol=1e-5)

    print("KERNEL_OK")
</pallas_src>

<mosaic_0001>
module attributes {stable_mosaic.version = 11 : i64} {
  func.func @kernel(%arg0: i32, %arg1: memref<8x256xf32, #tpu.memory_space<vmem>>, %arg2: memref<280x128xf32, #tpu.memory_space<vmem>>, %arg3: memref<8x128xf32, #tpu.memory_space<vmem>>) attributes {dimension_semantics = [#tpu.dimension_semantics<parallel>], iteration_bounds = array<i64: 1>, scalar_prefetch = 0 : i64, scratch_operands = 0 : i64, tpu.core_type = #tpu.core_type<tc>, window_params = [{transform_indices = @transform_0, window_bounds = array<i64: 8, 256>}, {pipeline_mode = #tpu.pipeline_mode<synchronous>, transform_indices = @transform_1, window_bounds = array<i64: 280, 128>}, {transform_indices = @transform_2, window_bounds = array<i64: 8, 128>}]} {
    %c0 = arith.constant 0 : index
    %c0_0 = arith.constant 0 : index
    %0 = vector.load %arg1[%c0, %c0_0] : memref<8x256xf32, #tpu.memory_space<vmem>>, vector<8x72xf32>
    %c0_1 = arith.constant 0 : index
    %c128 = arith.constant 128 : index
    %1 = vector.load %arg1[%c0_1, %c128] : memref<8x256xf32, #tpu.memory_space<vmem>>, vector<8x8xf32>
    %c0_2 = arith.constant 0 : index
    %c0_3 = arith.constant 0 : index
    %2 = vector.load %arg2[%c0_2, %c0_3] : memref<280x128xf32, #tpu.memory_space<vmem>>, vector<72x96xf32>
    %c72 = arith.constant 72 : index
    %c0_4 = arith.constant 0 : index
    %3 = vector.load %arg2[%c72, %c0_4] : memref<280x128xf32, #tpu.memory_space<vmem>>, vector<1x96xf32>
    %cst = arith.constant dense<0.000000e+00> : vector<8x96xf32>
    %4 = tpu.matmul %0, %2, %cst {dimension_numbers = #tpu.dot_dimension_numbers<[1], [0], [0], [1], [0, 0, 1, 1], [], []>} : vector<8x72xf32>, vector<72x96xf32>, vector<8x96xf32> -> vector<8x96xf32>
    %5 = vector.broadcast %3 : vector<1x96xf32> to vector<8x96xf32>
    %6 = arith.addf %4, %5 : vector<8x96xf32>
    %cst_5 = arith.constant 0.000000e+00 : f32
    %7 = vector.broadcast %cst_5 : f32 to vector<8x96xf32>
    %8 = arith.maximumf %6, %7 : vector<8x96xf32>
    %c80 = arith.constant 80 : index
    %c0_6 = arith.constant 0 : index
    %9 = vector.load %arg2[%c80, %c0_6] : memref<280x128xf32, #tpu.memory_space<vmem>>, vector<96x32xf32>
    %c176 = arith.constant 176 : index
    %c0_7 = arith.constant 0 : index
    %10 = vector.load %arg2[%c176, %c0_7] : memref<280x128xf32, #tpu.memory_space<vmem>>, vector<1x32xf32>
    %cst_8 = arith.constant dense<0.000000e+00> : vector<8x32xf32>
    %11 = tpu.matmul %8, %9, %cst_8 {dimension_numbers = #tpu.dot_dimension_numbers<[1], [0], [0], [1], [0, 0, 1, 1], [], []>} : vector<8x96xf32>, vector<96x32xf32>, vector<8x32xf32> -> vector<8x32xf32>
    %12 = vector.broadcast %10 : vector<1x32xf32> to vector<8x32xf32>
    %13 = arith.addf %11, %12 : vector<8x32xf32>
    %cst_9 = arith.constant 0.000000e+00 : f32
    %14 = vector.broadcast %cst_9 : f32 to vector<8x32xf32>
    %15 = arith.maximumf %13, %14 : vector<8x32xf32>
    %c184 = arith.constant 184 : index
    %c0_10 = arith.constant 0 : index
    %16 = vector.load %arg2[%c184, %c0_10] : memref<280x128xf32, #tpu.memory_space<vmem>>, vector<8x32xf32>
    %c192 = arith.constant 192 : index
    %c0_11 = arith.constant 0 : index
    %17 = vector.load %arg2[%c192, %c0_11] : memref<280x128xf32, #tpu.memory_space<vmem>>, vector<1x32xf32>
    %cst_12 = arith.constant dense<0.000000e+00> : vector<8x32xf32>
    %18 = tpu.matmul %1, %16, %cst_12 {dimension_numbers = #tpu.dot_dimension_numbers<[1], [0], [0], [1], [0, 0, 1, 1], [], []>} : vector<8x8xf32>, vector<8x32xf32>, vector<8x32xf32> -> vector<8x32xf32>
    %19 = vector.broadcast %17 : vector<1x32xf32> to vector<8x32xf32>
    %20 = arith.addf %18, %19 : vector<8x32xf32>
    %21 = arith.addf %15, %20 : vector<8x32xf32>
    %c200 = arith.constant 200 : index
    %c0_13 = arith.constant 0 : index
    %22 = vector.load %arg2[%c200, %c0_13] : memref<280x128xf32, #tpu.memory_space<vmem>>, vector<32x32xf32>
    %c232 = arith.constant 232 : index
    %c0_14 = arith.constant 0 : index
    %23 = vector.load %arg2[%c232, %c0_14] : memref<280x128xf32, #tpu.memory_space<vmem>>, vector<1x32xf32>
    %cst_15 = arith.constant dense<0.000000e+00> : vector<8x32xf32>
    %24 = tpu.matmul %21, %22, %cst_15 {dimension_numbers = #tpu.dot_dimension_numbers<[1], [0], [0], [1], [0, 0, 1, 1], [], []>} : vector<8x32xf32>, vector<32x32xf32>, vector<8x32xf32> -> vector<8x32xf32>
    %25 = vector.broadcast %23 : vector<1x32xf32> to vector<8x32xf32>
    %26 = arith.addf %24, %25 : vector<8x32xf32>
    %cst_16 = arith.constant 0.000000e+00 : f32
    %27 = vector.broadcast %cst_16 : f32 to vector<8x32xf32>
    %28 = arith.cmpf ogt, %26, %27 : vector<8x32xf32>
    %cst_17 = arith.constant 0.00999999977 : f32
    %29 = vector.broadcast %cst_17 : f32 to vector<8x32xf32>
    %30 = arith.mulf %29, %26 : vector<8x32xf32>
    %31 = arith.select %28, %26, %30 : vector<8x32xi1>, vector<8x32xf32>
    %c240 = arith.constant 240 : index
    %c0_18 = arith.constant 0 : index
    %32 = vector.load %arg2[%c240, %c0_18] : memref<280x128xf32, #tpu.memory_space<vmem>>, vector<32x128xf32>
    %c272 = arith.constant 272 : index
    %c0_19 = arith.constant 0 : index
    %33 = vector.load %arg2[%c272, %c0_19] : memref<280x128xf32, #tpu.memory_space<vmem>>, vector<1x128xf32>
    %cst_20 = arith.constant dense<0.000000e+00> : vector<8x128xf32>
    %34 = tpu.matmul %31, %32, %cst_20 {dimension_numbers = #tpu.dot_dimension_numbers<[1], [0], [0], [1], [0, 0, 1, 1], [], []>} : vector<8x32xf32>, vector<32x128xf32>, vector<8x128xf32> -> vector<8x128xf32>
    %35 = vector.broadcast %33 : vector<1x128xf32> to vector<8x128xf32>
    %36 = arith.addf %34, %35 : vector<8x128xf32>
    %c0_21 = arith.constant 0 : index
    %c0_22 = arith.constant 0 : index
    %37 = vector.load %arg3[%c0_21, %c0_22] : memref<8x128xf32, #tpu.memory_space<vmem>>, vector<8x128xf32>
    tpu.vector_store %arg3[%c0_21, %c0_22], %36 {strides = array<i32>} : memref<8x128xf32, #tpu.memory_space<vmem>>, vector<8x128xf32>,
    return
  }
  func.func @transform_0(%arg0: i32) -> (i32, i32) {
    %c0_i32 = arith.constant 0 : i32
    %c0_i32_0 = arith.constant 0 : i32
    return %arg0, %c0_i32 : i32, i32
  }
  func.func @transform_1(%arg0: i32) -> (i32, i32) {
    %c0_i32 = arith.constant 0 : i32
    %c0_i32_0 = arith.constant 0 : i32
    %c0_i32_1 = arith.constant 0 : i32
    return %c0_i32, %c0_i32_0 : i32, i32
  }
  func.func @transform_2(%arg0: i32) -> (i32, i32) {
    %c0_i32 = arith.constant 0 : i32
    %c0_i32_0 = arith.constant 0 : i32
    return %arg0, %c0_i32 : i32, i32
  }
}

</mosaic_0001>

<bundles_post_ra>
// kernel: tpu_custom_call.1
= control target key start
LH: loop header
LB: loop body
LE: loop exit
PB: predicated region body
PF: predicated region fallthrough
CT: control target
= control target key end

     0   :  { %7 = vsyncpa [#allocation3], 0  ;;  %s753_s0 = inlined_call_operand.hbm [shape: f32[8,256], index: 0, kind: input, shape index: {}]   ;;  %s754_s1 = inlined_call_operand.hbm [shape: f32[280,128], index: 1, kind: input, shape index: {}]   ;;  %s755_s2 = inlined_call_operand.hbm [shape: f32[8,128], index: 2, kind: output, shape index: {}]  }
   0x1   :  { %8 = vsyncpa [#allocation6], 0 }
   0x2   :  { %9 = vsyncpa [#allocation4], 0  ;;  %s680_s9 = smov [#allocation2]   ;;  %s681_s11 = smov [#allocation5]  }
   0x3   :  { %s16_s10 = sshll.u32 %s680_s9, 4  ;;  %s25_s12 = sshll.u32 %s681_s11, 4  ;;  %s17_s10 = int_to_ptr.vmem [resolvable:$true] %s16_s10  ;;  %s26_s12 = int_to_ptr.vmem [resolvable:$true] %s25_s12 }
   0x4   :  { %s622_s13 = scalar_lea.vmem %s17_s10, 256  ;;  %p627_p1 = scmp.lt.s32.totalorder %s17_s10, %s17_s10 }
   0x5   :  { %p623_p0 = scmp.ne.s32.totalorder %s17_s10, %s622_s13  ;;  %p628_p2 = scmp.lt.s32.totalorder %s622_s13, %s622_s13 }
   0x7   :  { %p629_p3 = por %p628_p2, %p627_p1 }
   0x9   :  { %p630_p4 = pnand %p629_p3, %p623_p0 }
   0xb   :  { %633 = shalt.err (!%p630_p4)
}
   0xc   :  { %19 = dma.hbm_to_vmem [thread:$0]  %s753_s0, 256, %s17_s10, [#allocation3]  }
   0xd   :  { %s642_s16 = scalar_lea.vmem %s26_s12, 4480  ;;  %p647_p6 = scmp.lt.s32.totalorder %s26_s12, %s26_s12 }
   0xe   :  { %p643_p5 = scmp.ne.s32.totalorder %s26_s12, %s642_s16  ;;  %p648_p7 = scmp.lt.s32.totalorder %s642_s16, %s642_s16 }
  0x10   :  { %p649_p8 = por %p648_p7, %p647_p6 }
  0x12   :  { %p650_p9 = pnand %p649_p8, %p643_p5 }
  0x14   :  { %653 = shalt.err (!%p650_p9)
}
  0x15   :  { %s682_s17 = smov 128   ;;  %s683_s18 = smov 8  }
  0x16   :  { %31 = dma.hbm_to_vmem [thread:$0]  %s754_s1, 4480, %s26_s12, [#allocation6], %s682_s17, %s682_s17, %s683_s18  }
  0x17   :  { %674 = dma.done.wait [#allocation3], 256  }
  0x18   :  { %675 = vsyncadd [#allocation3], 4294967040 }
  0x19   :  { %676 = dma.done.wait [#allocation6], 4480  }
  0x1a   :  { %677 = vsyncadd [#allocation6], 4294962816  ;;  %v684_v0 = vmov 0.0   ;;  %vm685_vm0 = vmmov 0   ;;  %v48_v1 = vld [vmem:[#allocation5 + $0x40] sm:$0xff]  ;;  %v47_v2 = vld [vmem:[#allocation5 + $0x38] sm:$0xff] }
  0x1b   :  { %532 = vmatprep.subr.mxu0 %v684_v0  ;;  %550 = vmatprep.mubr.msk.f32.mxu0 %vm685_vm0, %v684_v0  ;;  %v46_v3 = vld [vmem:[#allocation5 + $0x30] sm:$0xff]  ;;  %v140_v4 = vld [vmem:[#allocation5 + $0xa8] sm:$0xff]  ;;  %v139_v5 = vld [vmem:[#allocation5 + $0xa0] sm:$0xff]  ;;  %vm54_vm1 = vcmask 588800   ;;  %vm227_vm2 = vcmask 64512   ;;  %vm146_vm3 = vcmask 785408  }
  0x1c   :  { %553 = vmatprep.subr.mxu1 %v684_v0  ;;  %577 = vmatprep.mubr.msk.f32.mxu1 %vm685_vm0, %v684_v0  ;;  %v45_v6 = vld [vmem:[#allocation5 + $0x28] sm:$0xff]  ;;  %v138_v7 = vld [vmem:[#allocation5 + $0x98] sm:$0xff]  ;;  %v44_v8 = vld [vmem:[#allocation5 + $0x20] sm:$0xff]  ;;  %vm311_vm4 = vcmask 261120   ;;  %s686_s0 = smov [#allocation7]  }
  0x1d   :  { %533 = vmatpush3.msra.mxu0 %v48_v1  ;;  %554 = vmatpush3.msra.mxu1 %v140_v4  ;;  %v137_v9 = vld [vmem:[#allocation5 + $0x90] sm:$0xff]  ;;  %v43_v10 = vld [vmem:[#allocation5 + $0x18] sm:$0xff]  ;;  %v136_v11 = vld [vmem:[#allocation5 + $0x88] sm:$0xff]  ;;  %s477_s1 = sshll.u32 %s686_s0, 4  ;;  %s478_s1 = int_to_ptr.vmem [resolvable:$true] %s477_s1 }
  0x1e   :  { %534 = vmatprep.subr.mxu0 %v684_v0  ;;  %555 = vmatprep.subr.mxu1 %v684_v0  ;;  %v42_v12 = vld [vmem:[#allocation5 + $0x10] sm:$0xff]  ;;  %v135_v13 = vld [vmem:[#allocation5 + $0x80] sm:$0xff]  ;;  %v41_v14 = vld [vmem:[#allocation5 + $0x8] sm:$0xff]  ;;  %s654_s21 = scalar_lea.vmem %s478_s1, 128  ;;  %p659_p11 = scmp.lt.s32.totalorder %s478_s1, %s478_s1 }
  0x1f   :  { %535 = vmatpush3.msra.mxu0 %v47_v2  ;;  %556 = vmatpush3.msra.mxu1 %v139_v5  ;;  %v134_v15 = vld [vmem:[#allocation5 + $0x78] sm:$0xff]  ;;  %v40_v16 = vld [vmem:[#allocation5] sm:$0xff]  ;;  %v38_v17 = vld [vmem:[#allocation2] sm:$0xff]  ;;  %p655_p10 = scmp.ne.s32.totalorder %s478_s1, %s654_s21  ;;  %p660_p12 = scmp.lt.s32.totalorder %s654_s21, %s654_s21 }
  0x20   :  { %536 = vmatprep.subr.mxu0 %v684_v0  ;;  %557 = vmatprep.subr.mxu1 %v684_v0  ;;  %v133_v18 = vld [vmem:[#allocation5 + $0x70] sm:$0xff]  ;;  %v132_v19 = vld [vmem:[#allocation5 + $0x68] sm:$0xff]  ;;  %v131_v20 = vld [vmem:[#allocation5 + $0x60] sm:$0xff] }
  0x21   :  { %537 = vmatpush3.msra.mxu0 %v46_v3  ;;  %558 = vmatpush3.msra.mxu1 %v138_v7  ;;  %v130_v21 = vld [vmem:[#allocation5 + $0x58] sm:$0xff]  ;;  %v129_v23 = vld [vmem:[#allocation5 + $0x50] sm:$0xff]  ;;  %v487_v25 = vld [vmem:[#allocation5 + $0x48] ss:$0 sm:$0xff]  ;;  %p661_p13 = por %p660_p12, %p659_p11 }
  0x22   :  { %538 = vmatprep.subr.mxu0 %v684_v0  ;;  %559 = vmatprep.subr.mxu1 %v684_v0  ;;  %v221_v22 = vld [vmem:[#allocation5 + $0xb8] sm:$0xff]  ;;  %v305_v30 = vld [vmem:[#allocation5 + $0xe0] sm:$0xff]  ;;  %v303_v34 = vld [vmem:[#allocation5 + $0xd0] sm:$0xff] }
  0x23   :  { %539 = vmatpush3.msra.mxu0 %v45_v6  ;;  %560 = vmatpush3.msra.mxu1 %v137_v9  ;;  %v39_v24 = vld [vmem:[#allocation2 + $0x8] sm:$0xff]  ;;  %v302_v35 = vld [vmem:[#allocation5 + $0xc8] sm:$0xff]  ;;  %v489_v37 = vld [vmem:[#allocation5 + $0xb0] ss:$0 sm:$0xff]  ;;  %p662_p0 = pnand %p661_p13, %p655_p10 }
  0x24   :  { %540 = vmatprep.subr.mxu0 %v684_v0  ;;  %561 = vmatprep.subr.mxu1 %v684_v0  ;;  %v304_v32 = vld [vmem:[#allocation5 + $0xd8] sm:$0xff]  ;;  %v391_v36 = vld [vmem:[#allocation5 + $0x108] sm:$0xff]  ;;  %v491_v38 = vld [vmem:[#allocation5 + $0xc0] ss:$0 sm:$0xff] }
  0x25   :  { %541 = vmatpush3.msra.mxu0 %v44_v8  ;;  %562 = vmatpush3.msra.mxu1 %v136_v11  ;;  %v390_v45 = vld [vmem:[#allocation5 + $0x100] sm:$0xff]  ;;  %v389_v46 = vld [vmem:[#allocation5 + $0xf8] sm:$0xff]  ;;  %v388_v47 = vld [vmem:[#allocation5 + $0xf0] sm:$0xff] }
  0x26   :  { %542 = vmatprep.subr.mxu0 %v684_v0  ;;  %563 = vmatprep.subr.mxu1 %v684_v0  ;;  %v493_v48 = vld [vmem:[#allocation5 + $0xe8] ss:$0 sm:$0xff]  ;;  %v495_v54 = vld [vmem:[#allocation5 + $0x110] ss:$0 sm:$0xff] }
  0x27   :  { %543 = vmatpush3.msra.mxu0 %v43_v10  ;;  %564 = vmatpush3.msra.mxu1 %v135_v13 }
  0x28   :  { %544 = vmatprep.subr.mxu0 %v684_v0  ;;  %565 = vmatprep.subr.mxu1 %v684_v0 }
  0x29   :  { %545 = vmatpush3.msra.mxu0 %v42_v12  ;;  %566 = vmatpush3.msra.mxu1 %v134_v15 }
  0x2a   :  { %546 = vmatprep.subr.mxu0 %v684_v0  ;;  %567 = vmatprep.subr.mxu1 %v684_v0 }
  0x2b   :  { %547 = vmatpush3.msra.mxu0 %v41_v14  ;;  %568 = vmatpush3.msra.mxu1 %v133_v18 }
  0x2c   :  { %548 = vmatprep.subr.mxu0 %v684_v0  ;;  %569 = vmatprep.subr.mxu1 %v684_v0 }
  0x2d   :  { %549 = vmatpush3.msra.mxu0 %v40_v16  ;;  %570 = vmatpush3.msra.mxu1 %v132_v19 }
  0x2e   :  { %551 = vmatmul.mubr.msk.f32.vlgmr.msra.gmra.mxu0 %vm54_vm1, %v38_v17  ;;  %580 = vmatprep.subr.mxu0 %v684_v0 }
  0x2f   :  { %582 = vmatprep.mubr.msk.f32.mxu0 %vm685_vm0, %v684_v0  ;;  %571 = vmatprep.subr.mxu1 %v684_v0 }
  0x30   :  { %572 = vmatpush3.msra.mxu1 %v131_v20  ;;  %581 = vmatpush3.msra.mxu0 %v221_v22 }
  0x31   :  { %573 = vmatprep.subr.mxu1 %v684_v0  ;;  %585 = vmatprep.subr.mxu0 %v684_v0 }
  0x32   :  { %574 = vmatpush3.msra.mxu1 %v130_v21  ;;  %583 = vmatmul.mubr.msk.f32.vlgmr.msra.gmra.mxu0 %vm227_vm2, %v39_v24 }
  0x33   :  { %575 = vmatprep.subr.mxu1 %v684_v0  ;;  %593 = vmatprep.mubr.msk.f32.mxu0 %vm685_vm0, %v684_v0 }
  0x34   :  { %576 = vmatpush3.msra.mxu1 %v129_v23  ;;  %586 = vmatpush3.msra.mxu0 %v305_v30 }
  0x35   :  { %596 = vmatprep.subr.mxu1 %v684_v0  ;;  %587 = vmatprep.subr.mxu0 %v684_v0 }
  0x36   :  { %588 = vmatpush3.msra.mxu0 %v304_v32 }
  0x37   :  { %589 = vmatprep.subr.mxu0 %v684_v0 }
  0x38   :  { %590 = vmatpush3.msra.mxu0 %v303_v34 }
  0x39   :  { %591 = vmatprep.subr.mxu0 %v684_v0 }
  0x3a   :  { %592 = vmatpush3.msra.mxu0 %v302_v35 }
  0xee   :  { %v124_v26 = vpop.f32.mrf.mxu0 }
  0xef   :  { %v125_v27 = vadd.f32 %v487_v25, %v124_v26 }
  0xf0   :  { %v552_v28 = vpop.f32.mrf.mxu0 }
  0xf1   :  { %v128_v29 = vmax.f32 %v125_v27, 0.0 }
  0xf2   :  { %v297_v31 = vpop.f32.mrf.mxu0 }
  0xf3   :  { %578 = vmatmul.mubr.msk.f32.vlgmr.msra.gmra.mxu1 %vm146_vm3, %v128_v29  ;;  %v298_v41 = vadd.f32 %v491_v38, %v297_v31 }
  0xf4   :  { %604 = vmatprep.mubr.msk.f32.mxu1 %vm685_vm0, %v684_v0  ;;  %v584_v33 = vpop.f32.mrf.mxu0  ;;  %597 = vmatpush3.msra.mxu1 %v391_v36 }
  0xf5   :  { %598 = vmatprep.subr.mxu1 %v684_v0 }
  0xf6   :  { %599 = vmatpush3.msra.mxu1 %v390_v45 }
  0xf7   :  { %600 = vmatprep.subr.mxu1 %v684_v0 }
  0xf8   :  { %601 = vmatpush3.msra.mxu1 %v389_v46 }
  0xf9   :  { %602 = vmatprep.subr.mxu1 %v684_v0 }
  0xfa   :  { %603 = vmatpush3.msra.mxu1 %v388_v47 }
 0x1b3   :  { %v216_v39 = vpop.f32.mrf.mxu1 }
 0x1b4   :  { %v217_v40 = vadd.f32 %v489_v37, %v216_v39 }
 0x1b5   :  { %v579_v42 = vpop.f32.mrf.mxu1 }
 0x1b6   :  { %v220_v43 = vmax.f32 %v217_v40, 0.0 }
 0x1b8   :  { %v301_v44 = vadd.f32 %v298_v41, %v220_v43 }
 0x1ba   :  { %594 = vmatmul.mubr.msk.f32.vlgmr.msra.gmra.mxu0 %vm311_vm4, %v301_v44 }
 0x27a   :  { %v381_v49 = vpop.f32.mrf.mxu0 }
 0x27b   :  { %v382_v50 = vadd.f32 %v493_v48, %v381_v49 }
 0x27c   :  { %v595_v51 = vpop.f32.mrf.mxu0 }
 0x27d   :  { %vm385_vm5 = vcmp.gt.f32.partialorder %v382_v50, 0.0  ;;  %v386_v52 = vmul.f32 0.01, %v382_v50 }
 0x27f   :  { %v387_v53 = vsel %vm385_vm5, %v382_v50, %v386_v52 }
 0x280   :  { %605 = vmatmul.mubr.msk.f32.vlgmr.msra.gmra.mxu1 %vm311_vm4, %v387_v53 }
 0x340   :  { %v466_v55 = vpop.f32.mrf.mxu1 }
 0x341   :  { %v467_v56 = vadd.f32 %v495_v54, %v466_v55 }
 0x342   :  { %v606_v57 = vpop.f32.mrf.mxu1 }
 0x343   :  { %470 = vst [vmem:[#allocation7] sm:$0xff] %v467_v56 }
 0x344   :  { %665 = shalt.err (!%p662_p0)
}
 0x345   :  { %480 = dma.vmem_to_hbm [thread:$0]  %s478_s1, 128, %s755_s2, [#allocation4]  }
 0x346   :  { %678 = dma.done.wait [#allocation4], 128  }
 0x347   :  { %679 = vsyncadd [#allocation4], 4294967168 }
 0x348   :  { %484 = vsyncpa [#allocation3], 1 }
 0x349   :  { %485 = vsyncpa [#allocation6], 1 }
 0x34a   :  { %486 = vsyncpa [#allocation4], 1 }

</bundles_post_ra>
